<compile_context>
chip_gen: v7x
topology: tpu7x:2x2x1
jax: 0.10.0
libtpu: 0.0.40
codegen_flags: <defaults>
</compile_context>

<pallas_src>
import jax
import jax.numpy as jnp
from jax.experimental import pallas as pl
from jax.experimental.pallas import tpu as pltpu

REPEAT = 32  # hard-coded `repeat(1, 1, 32)` in the reference forward
assert REPEAT & (REPEAT - 1) == 0  # lane-tiling below doubles log2(REPEAT) times


def mda_output_kernel(h_ref, w12_ref, b12_ref, w_ref, bw_ref, out_ref):
    """One block of `tb` batch elements per grid step.

    h_ref:   (tb, S, D)     input sequences
    w12_ref: (D, D)         fused (q_linear, W1, W2) weight, (in, out) layout
    b12_ref: (1, D)         fused bias
    w_ref:   (D, D)         W weight, (in, out) layout
    bw_ref:  (1, D)         W bias
    out_ref: (tb, 1, 32*D)  lane-dense slab: 32 identical copies of the pooled
                            row, flattened along the lane axis
    """
    tb, S, D = h_ref.shape
    h3 = h_ref[...]                                   # (tb, S, D)
    h2 = h3.reshape(tb * S, D)                        # one big M tile for the MXU

    # a = W1(h) + W2(q_linear(h))  -- q_linear folded into W12/b12 on the host.
    a = jnp.dot(h2.astype(w12_ref.dtype), w12_ref[...],
                preferred_element_type=jnp.float32) + b12_ref[...]
    # ELU(alpha=1); clamp the exp argument so the unselected branch never overflows.
    a = jnp.where(a > 0.0, a, jnp.exp(jnp.minimum(a, 0.0)) - 1.0)
    # z = W(a)
    z = jnp.dot(a.astype(w_ref.dtype), w_ref[...],
                preferred_element_type=jnp.float32) + bw_ref[...]

    # generate_p: per-position dot(z, h) and a per-batch normalizer.
    h3f = h3.astype(jnp.float32)
    z3 = z.reshape(tb, S, D)
    prob = jnp.sum(z3 * h3f, axis=-1, keepdims=True)   # (tb, S, 1)  lane reduce
    total = jnp.sum(prob, axis=1, keepdims=True)       # (tb, 1, 1)  sublane reduce

    # p.repeat(1,1,32).T @ h == 32 identical rows of sum_s p[s]*h[s].
    # Pool first, normalize once with the EUP reciprocal (weighted sum on
    # VPU/XLU instead of a 32x-redundant MXU matmul).
    pooled = jnp.sum(prob * h3f, axis=1, keepdims=True)          # (tb, 1, D)
    pooled = pooled * pl.reciprocal(total, approx=True)          # (tb, 1, D)

    # Lane-dense tiling: log2(REPEAT) concats along lanes -> (tb, 1, 32*D).
    tiled = pooled
    for _ in range(REPEAT.bit_length() - 1):                     # 2**5 == 32
        tiled = jnp.concatenate([tiled, tiled], axis=-1)
    out_ref[...] = tiled.astype(out_ref.dtype)


def fold_mda_params(params, mxu_dtype=None):
    """Pre-fold q_linear into W1/W2 (exact) and pre-transpose to (in, out).

    a = W1(h) + W2(q_linear(h)) = h @ (W1^T + Wq^T W2^T) + (b1 + b2 + bq @ W2^T)

    mxu_dtype=jnp.bfloat16 casts the matmul weights (h is cast in-kernel to
    match) for 2x MXU throughput; accumulation and pointwise math stay f32.
    """
    D = params["wq"].shape[0]
    f32 = jnp.float32
    wq_t = params["wq"].T.astype(f32)
    w1_t = params["w1"].T.astype(f32)
    w2_t = params["w2"].T.astype(f32)
    w_t = params["w"].T.astype(f32)

    w12 = w1_t + wq_t @ w2_t
    b12 = (params["b1"].astype(f32) + params["b2"].astype(f32)
           + params["bq"].astype(f32) @ w2_t)

    wd = mxu_dtype if mxu_dtype is not None else w12.dtype
    return {
        "w12": w12.astype(wd),
        "b12": b12.reshape(1, D),
        "w": w_t.astype(wd),
        "bw": params["bw"].astype(f32).reshape(1, D),
    }


def _choose_batch_block(B, S, target_rows=128):
    """Batch elements per grid step: aim for ~128 MXU rows (tb*S), require
    tb | B, and keep >=2 grid steps when B >= 2 (v7x: 2 TensorCores share the
    "parallel" grid axis)."""
    tb = max(1, min(B, target_rows // max(S, 1)))
    while tb > 1 and B // tb < 2:
        tb -= 1
    while B % tb:
        tb -= 1
    return tb


def mda_output(h, folded, *, batch_block=None):
    """h: (B, S, D). folded: output of fold_mda_params(...). Returns (B, 32, D)."""
    B, S, D = h.shape
    tb = batch_block if batch_block is not None else _choose_batch_block(B, S)
    assert B % tb == 0, (B, tb)

    const2d = lambda shape: pl.BlockSpec(shape, lambda i: (0, 0))
    # NOTE: for large D on v7x (64 MiB VMEM, 32 MiB scoped default), single-buffer
    # the constant weight blocks (pipeline_mode=pl.Buffered(1)) and/or fold with
    # mxu_dtype=bf16; at D=32 the double-buffered weights are only a few KiB.

    out_flat = pl.pallas_call(
        mda_output_kernel,
        out_shape=jax.ShapeDtypeStruct((B, 1, REPEAT * D), h.dtype),
        grid_spec=pltpu.PrefetchScalarGridSpec(
            num_scalar_prefetch=0,
            grid=(B // tb,),
            in_specs=[
                pl.BlockSpec((tb, S, D), lambda i: (i, 0, 0)),   # h
                const2d((D, D)),                                 # W12 (fused)
                const2d((1, D)),                                 # b12 (fused)
                const2d((D, D)),                                 # W
                const2d((1, D)),                                 # bW
            ],
            out_specs=pl.BlockSpec((tb, 1, REPEAT * D), lambda i: (i, 0, 0)),
        ),
        compiler_params=pltpu.CompilerParams(
            dimension_semantics=("parallel",)),
    )(h, folded["w12"], folded["b12"], folded["w"], folded["bw"])

    # Free, contiguous reinterpretation of the lane-dense slab.
    return out_flat.reshape(B, REPEAT, D)


def mda_output_ref(h, params):
    """Pure-JAX reference mirroring the PyTorch forward (unfused)."""
    lin = lambda x, w, b: jnp.einsum("bsd,od->bso", x, w) + b
    q = lin(h, params["wq"], params["bq"])
    a = lin(h, params["w1"], params["b1"]) + lin(q, params["w2"], params["b2"])
    a = jnp.where(a > 0, a, jnp.exp(a) - 1.0)
    z = lin(a, params["w"], params["bw"])
    prob = jnp.sum(z * h, axis=-1, keepdims=True)              # (B, S, 1)
    total = jnp.sum(prob, axis=1, keepdims=True)               # (B, 1, 1)
    p = prob / total                                           # (B, S, 1)
    p_t = jnp.broadcast_to(jnp.swapaxes(p, 1, 2), (h.shape[0], REPEAT, h.shape[1]))
    return jnp.einsum("brs,bsd->brd", p_t, h)


if __name__ == "__main__":
    B, S, D = 2, 8, 32  # input_dim = hidden_dim = output_dim = D

    key = jax.random.PRNGKey(0)
    keys = jax.random.split(key, 9)
    scale = 1.0 / jnp.sqrt(D)
    params = {
        "wq": jax.random.uniform(keys[0], (D, D), jnp.float32, -scale, scale),
        "bq": jax.random.uniform(keys[1], (D,), jnp.float32, -scale, scale),
        "w1": jax.random.uniform(keys[2], (D, D), jnp.float32, -scale, scale),
        "b1": jax.random.uniform(keys[3], (D,), jnp.float32, -scale, scale),
        "w2": jax.random.uniform(keys[4], (D, D), jnp.float32, -scale, scale),
        "b2": jax.random.uniform(keys[5], (D,), jnp.float32, -scale, scale),
        "w": jax.random.uniform(keys[6], (D, D), jnp.float32, -scale, scale),
        "bw": jax.random.uniform(keys[7], (D,), jnp.float32, -scale, scale),
    }
    h = jax.random.normal(keys[8], (B, S, D), jnp.float32)

    folded = fold_mda_params(params)   # one-time host-side fold of q_linear into W1/W2
    out = mda_output(h, folded)
    out = jax.block_until_ready(out)

    ref = mda_output_ref(h, params)
    assert out.shape == (B, REPEAT, D)
    # Tolerance accounts for the approximate EUP reciprocal (~4e-4 rel) plus
    # the (exact-algebra, different-rounding) q_linear fold.
    assert jnp.allclose(out, ref, atol=1e-3, rtol=2e-3)

    print("KERNEL_OK")
</pallas_src>

<mosaic_0001>
module attributes {stable_mosaic.version = 11 : i64} {
  func.func @mda_output_kernel(%arg0: i32, %arg1: memref<1x8x32xf32, #tpu.memory_space<vmem>>, %arg2: memref<32x32xf32, #tpu.memory_space<vmem>>, %arg3: memref<1x32xf32, #tpu.memory_space<vmem>>, %arg4: memref<32x32xf32, #tpu.memory_space<vmem>>, %arg5: memref<1x32xf32, #tpu.memory_space<vmem>>, %arg6: memref<1x1x1024xf32, #tpu.memory_space<vmem>>) attributes {dimension_semantics = [#tpu.dimension_semantics<parallel>], iteration_bounds = array<i64: 2>, scalar_prefetch = 0 : i64, scratch_operands = 0 : i64, tpu.core_type = #tpu.core_type<tc>, window_params = [{transform_indices = @transform_0, window_bounds = array<i64: 1, 8, 32>}, {pipeline_mode = #tpu.pipeline_mode<synchronous>, transform_indices = @transform_1, window_bounds = array<i64: 32, 32>}, {pipeline_mode = #tpu.pipeline_mode<synchronous>, transform_indices = @transform_2, window_bounds = array<i64: 1, 32>}, {pipeline_mode = #tpu.pipeline_mode<synchronous>, transform_indices = @transform_3, window_bounds = array<i64: 32, 32>}, {pipeline_mode = #tpu.pipeline_mode<synchronous>, transform_indices = @transform_4, window_bounds = array<i64: 1, 32>}, {transform_indices = @transform_5, window_bounds = array<i64: 1, 1, 1024>}]} {
    %c0 = arith.constant 0 : index
    %c0_0 = arith.constant 0 : index
    %c0_1 = arith.constant 0 : index
    %0 = vector.load %arg1[%c0, %c0_0, %c0_1] : memref<1x8x32xf32, #tpu.memory_space<vmem>>, vector<1x8x32xf32>
    %1 = vector.shape_cast %0 : vector<1x8x32xf32> to vector<8x32xf32>
    %c0_2 = arith.constant 0 : index
    %c0_3 = arith.constant 0 : index
    %2 = vector.load %arg2[%c0_2, %c0_3] : memref<32x32xf32, #tpu.memory_space<vmem>>, vector<32x32xf32>
    %cst = arith.constant dense<0.000000e+00> : vector<8x32xf32>
    %3 = tpu.matmul %1, %2, %cst {dimension_numbers = #tpu.dot_dimension_numbers<[1], [0], [0], [1], [0, 0, 1, 1], [], []>} : vector<8x32xf32>, vector<32x32xf32>, vector<8x32xf32> -> vector<8x32xf32>
    %c0_4 = arith.constant 0 : index
    %c0_5 = arith.constant 0 : index
    %4 = vector.load %arg3[%c0_4, %c0_5] : memref<1x32xf32, #tpu.memory_space<vmem>>, vector<1x32xf32>
    %5 = vector.broadcast %4 : vector<1x32xf32> to vector<8x32xf32>
    %6 = arith.addf %3, %5 : vector<8x32xf32>
    %cst_6 = arith.constant 0.000000e+00 : f32
    %7 = vector.broadcast %cst_6 : f32 to vector<8x32xf32>
    %8 = arith.cmpf ogt, %6, %7 : vector<8x32xf32>
    %cst_7 = arith.constant 0.000000e+00 : f32
    %9 = vector.broadcast %cst_7 : f32 to vector<8x32xf32>
    %10 = arith.minimumf %6, %9 : vector<8x32xf32>
    %11 = math.exp %10 : vector<8x32xf32>
    %cst_8 = arith.constant 1.000000e+00 : f32
    %12 = vector.broadcast %cst_8 : f32 to vector<8x32xf32>
    %13 = arith.subf %11, %12 : vector<8x32xf32>
    %14 = arith.select %8, %6, %13 : vector<8x32xi1>, vector<8x32xf32>
    %c0_9 = arith.constant 0 : index
    %c0_10 = arith.constant 0 : index
    %15 = vector.load %arg4[%c0_9, %c0_10] : memref<32x32xf32, #tpu.memory_space<vmem>>, vector<32x32xf32>
    %cst_11 = arith.constant dense<0.000000e+00> : vector<8x32xf32>
    %16 = tpu.matmul %14, %15, %cst_11 {dimension_numbers = #tpu.dot_dimension_numbers<[1], [0], [0], [1], [0, 0, 1, 1], [], []>} : vector<8x32xf32>, vector<32x32xf32>, vector<8x32xf32> -> vector<8x32xf32>
    %c0_12 = arith.constant 0 : index
    %c0_13 = arith.constant 0 : index
    %17 = vector.load %arg5[%c0_12, %c0_13] : memref<1x32xf32, #tpu.memory_space<vmem>>, vector<1x32xf32>
    %18 = vector.broadcast %17 : vector<1x32xf32> to vector<8x32xf32>
    %19 = arith.addf %16, %18 : vector<8x32xf32>
    %20 = vector.shape_cast %19 : vector<8x32xf32> to vector<1x8x32xf32>
    %21 = arith.mulf %20, %0 : vector<1x8x32xf32>
    %cst_14 = arith.constant dense<0.000000e+00> : vector<1x8xf32>
    %22 = vector.multi_reduction <add>, %21, %cst_14 [2] : vector<1x8x32xf32> to vector<1x8xf32>
    %23 = vector.shape_cast %22 : vector<1x8xf32> to vector<1x8x1xf32>
    %cst_15 = arith.constant dense<0.000000e+00> : vector<1x1xf32>
    %24 = vector.multi_reduction <add>, %23, %cst_15 [1] : vector<1x8x1xf32> to vector<1x1xf32>
    %25 = vector.shape_cast %24 : vector<1x1xf32> to vector<1x1x1xf32>
    %26 = vector.broadcast %23 : vector<1x8x1xf32> to vector<1x8x32xf32>
    %27 = arith.mulf %26, %0 : vector<1x8x32xf32>
    %cst_16 = arith.constant dense<0.000000e+00> : vector<1x32xf32>
    %28 = vector.multi_reduction <add>, %27, %cst_16 [1] : vector<1x8x32xf32> to vector<1x32xf32>
    %29 = vector.shape_cast %28 : vector<1x32xf32> to vector<1x1x32xf32>
    %30 = tpu.reciprocal %25 {approx = true} : vector<1x1x1xf32> -> vector<1x1x1xf32>
    %31 = vector.broadcast %30 : vector<1x1x1xf32> to vector<1x1x32xf32>
    %32 = arith.mulf %29, %31 : vector<1x1x32xf32>
    %33 = tpu.concatenate %32, %32 in 2 : vector<1x1x32xf32>, vector<1x1x32xf32> -> vector<1x1x64xf32>
    %34 = tpu.concatenate %33, %33 in 2 : vector<1x1x64xf32>, vector<1x1x64xf32> -> vector<1x1x128xf32>
    %35 = tpu.concatenate %34, %34 in 2 : vector<1x1x128xf32>, vector<1x1x128xf32> -> vector<1x1x256xf32>
    %36 = tpu.concatenate %35, %35 in 2 : vector<1x1x256xf32>, vector<1x1x256xf32> -> vector<1x1x512xf32>
    %37 = tpu.concatenate %36, %36 in 2 : vector<1x1x512xf32>, vector<1x1x512xf32> -> vector<1x1x1024xf32>
    %c0_17 = arith.constant 0 : index
    %c0_18 = arith.constant 0 : index
    %c0_19 = arith.constant 0 : index
    %38 = vector.load %arg6[%c0_17, %c0_18, %c0_19] : memref<1x1x1024xf32, #tpu.memory_space<vmem>>, vector<1x1x1024xf32>
    tpu.vector_store %arg6[%c0_17, %c0_18, %c0_19], %37 {strides = array<i32>} : memref<1x1x1024xf32, #tpu.memory_space<vmem>>, vector<1x1x1024xf32>,
    return
  }
  func.func @transform_0(%arg0: i32) -> (i32, i32, i32) {
    %c0_i32 = arith.constant 0 : i32
    %c0_i32_0 = arith.constant 0 : i32
    %c0_i32_1 = arith.constant 0 : i32
    return %arg0, %c0_i32, %c0_i32_0 : i32, i32, i32
  }
  func.func @transform_1(%arg0: i32) -> (i32, i32) {
    %c0_i32 = arith.constant 0 : i32
    %c0_i32_0 = arith.constant 0 : i32
    %c0_i32_1 = arith.constant 0 : i32
    return %c0_i32, %c0_i32_0 : i32, i32
  }
  func.func @transform_2(%arg0: i32) -> (i32, i32) {
    %c0_i32 = arith.constant 0 : i32
    %c0_i32_0 = arith.constant 0 : i32
    %c0_i32_1 = arith.constant 0 : i32
    return %c0_i32, %c0_i32_0 : i32, i32
  }
  func.func @transform_3(%arg0: i32) -> (i32, i32) {
    %c0_i32 = arith.constant 0 : i32
    %c0_i32_0 = arith.constant 0 : i32
    %c0_i32_1 = arith.constant 0 : i32
    return %c0_i32, %c0_i32_0 : i32, i32
  }
  func.func @transform_4(%arg0: i32) -> (i32, i32) {
    %c0_i32 = arith.constant 0 : i32
    %c0_i32_0 = arith.constant 0 : i32
    %c0_i32_1 = arith.constant 0 : i32
    return %c0_i32, %c0_i32_0 : i32, i32
  }
  func.func @transform_5(%arg0: i32) -> (i32, i32, i32) {
    %c0_i32 = arith.constant 0 : i32
    %c0_i32_0 = arith.constant 0 : i32
    %c0_i32_1 = arith.constant 0 : i32
    return %arg0, %c0_i32, %c0_i32_0 : i32, i32, i32
  }
}

</mosaic_0001>

<bundles_post_ra>
// kernel: tpu_custom_call.1
= control target key start
LH: loop header
LB: loop body
LE: loop exit
PB: predicated region body
PF: predicated region fallthrough
CT: control target
= control target key end

     0   :  { %10 = vsyncpa [#allocation3], 0  ;;  %s1190_s0 = inlined_call_operand.hbm [shape: f32[2,8,32], index: 0, kind: input, shape index: {}]   ;;  %s1191_s1 = inlined_call_operand.hbm [shape: f32[32,32], index: 1, kind: input, shape index: {}]   ;;  %s1192_s2 = inlined_call_operand.vmem [shape: f32[1,32], index: 2, kind: input, shape index: {}]   ;;  %s1193_s3 = inlined_call_operand.hbm [shape: f32[32,32], index: 3, kind: input, shape index: {}]   ;;  %s1194_s4 = inlined_call_operand.vmem [shape: f32[1,32], index: 4, kind: input, shape index: {}]   ;;  %s1195_s5 = inlined_call_operand.hbm [shape: f32[2,1,1024], index: 5, kind: output, shape index: {}]  }
   0x1   :  { %12 = vsyncpa [#allocation3 + $0x1], 0 }
   0x2   :  { %13 = vsyncpa [#allocation6], 0 }
   0x3   :  { %14 = vsyncpa [#allocation4], 0 }
   0x4   :  { %16 = vsyncpa [#allocation4 + $0x1], 0  ;;  %s946_s18 = smov 0   ;;  %s948_s19 = smov 0  }
   0x5   :  { %s950_s20 = smov 0   ;;  %s952_s21 = smov 0  }
   0x6 LB: > { %s967_s22 = sadd.s32 4294967295, %s902_s21   ;;  %s600_s23 = sadd.s32 4294967294, %s902_s21   ;;  %s902_s21 = sphi %s952_s21, %s1215_s21   ;;  %s898_s20 = sphi %s950_s20, %s1214_s20   ;;  %s894_s19 = sphi %s948_s19, %s1213_s19   ;;  %s890_s18 = sphi %s946_s18, %s1212_s18  }
   0x7   : > { %p42_p0 = scmp.ne.s32.totalorder %s894_s19, %s890_s18  ;;  %p1196_p1 = scmp.eq.s32.totalorder %s967_s22, 0 }
   0x8   : > { %p156_p3 = scmp.eq.s32.totalorder %s600_s23, 1  ;;  %p601_p5 = scmp.ge.s32.totalorder %s902_s21, 1 }
   0x9   : > { %p976_p4 = por %p1196_p1, %p42_p0  ;;  %p163_p7 = scmp.lt.s32.totalorder %s902_s21, 3 }
   0xa   : > { %p981_p6 = por %p156_p3, %p42_p0  ;;  %s904_s27 = smov [#allocation5]  }
   0xb   : > { %s1199_s24 = scalar_select %p976_p4, 1, 0 }
   0xc   : > { %s1200_s25 = scalar_select %p981_p6, 1, 0 }
   0xd   : > { %p986_p8 = pnand %p601_p5, %p163_p7  ;;  %s175_s28 = sshll.u32 %s904_s27, 4  ;;  %s990_s28 = int_to_ptr.vmem [resolvable:$true] %s175_s28 }
   0xe   : > { %s905_s30 = smov [#allocation7]   ;;  %s746_s9 = scalar_lea.hbm %s1191_s1, 512 }
   0xf   : > { %p679_p9 = pneg %p986_p8  ;;  %s191_s6 = sshll.u32 %s905_s30, 4  ;;  %s1001_s6 = int_to_ptr.vmem [resolvable:$true] %s191_s6 }
  0x10   : > { %p747_p12 = scmp.ne.s32.totalorder %s1191_s1, %s746_s9  ;;  %p753_p5 = scmp.lt.u32.totalorder %s746_s9, %s1191_s1 }
  0x11   : > { %p997_p11 = pnand %p679_p9, %p1196_p1 }
  0x13   : > { %p748_p13 = pneg %p997_p11 }
  0x15   : > { %p749_p0 = pnand %p748_p13, %p747_p12 }
  0x17   : > { %p750_p3 = pneg %p749_p0 }
  0x19   : > { %p755_p7 = pnand %p753_p5, %p750_p3 }
  0x1b   : > { %758 = shalt.err (!%p755_p7)
}
  0x1c   : > { %s759_s14 = scalar_lea.vmem %s990_s28, 512  ;;  %p767_p2 = scmp.lt.s32.totalorder %s990_s28, %s990_s28 }
  0x1d   : > { %p760_p9 = scmp.ne.s32.totalorder %s990_s28, %s759_s14  ;;  %p768_p12 = scmp.lt.s32.totalorder %s759_s14, %s759_s14 }
  0x1f   : > { %p762_p10 = pnand %p760_p9, %p748_p13  ;;  %p769_p0 = por %p768_p12, %p767_p2 }
  0x21   : > { %p763_p1 = pneg %p762_p10 }
  0x23   : > { %p770_p6 = pnand %p769_p0, %p763_p1 }
  0x25   : > { %773 = shalt.err (!%p770_p6)
}
  0x26   : > { %s906_s15 = smov 128   ;;  %s907_s16 = smov 8  }
  0x27   : > { %682 = dma.hbm_to_vmem [thread:$0]  (!%p997_p11), %s1191_s1, 512, %s990_s28, [#allocation6], %s906_s15, %s906_s15, %s907_s16  }
  0x28   : > { %s774_s7 = scalar_lea.hbm %s1193_s3, 512 }
  0x29   : > { %p775_p2 = scmp.ne.s32.totalorder %s1193_s3, %s774_s7  ;;  %p781_p10 = scmp.lt.u32.totalorder %s774_s7, %s1193_s3 }
  0x2b   : > { %p777_p1 = pnand %p775_p2, %p748_p13 }
  0x2d   : > { %p778_p6 = pneg %p777_p1 }
  0x2f   : > { %p783_p3 = pnand %p781_p10, %p778_p6 }
  0x31   : > { %786 = shalt.err (!%p783_p3)
}
  0x32   : > { %s787_s28 = scalar_lea.vmem %s1001_s6, 512  ;;  %p795_p12 = scmp.lt.s32.totalorder %s1001_s6, %s1001_s6 }
  0x33   : > { %p788_p5 = scmp.ne.s32.totalorder %s1001_s6, %s787_s28  ;;  %p796_p0 = scmp.lt.s32.totalorder %s787_s28, %s787_s28 }
  0x35   : > { %p790_p7 = pnand %p788_p5, %p748_p13  ;;  %p797_p2 = por %p796_p0, %p795_p12 }
  0x37   : > { %p791_p9 = pneg %p790_p7 }
  0x39   : > { %p798_p1 = pnand %p797_p2, %p791_p9 }
  0x3b   : > { %801 = shalt.err (!%p798_p1)
}
  0x3c   : > { %685 = dma.hbm_to_vmem [thread:$0]  (!%p997_p11), %s1193_s3, 512, %s1001_s6, [#allocation6], %s906_s15, %s906_s15, %s907_s16  }
  0x3d   : > { %s1056_s14 = sadd.s32 1, %s902_s21   ;;  %s29_s29 = sadd.s32 1, %s898_s20 }
  0x3e   : > { %s26_s17 = ssub.s32 %s902_s21, %s1056_s14  ;;  %p36_p13 = scmp.ne.s32.totalorder %s898_s20, %s894_s19 }
  0x3f   : > { %p27_p6 = scmp.eq.s32.totalorder %s26_s17, 0  ;;  %p37_p10 = scmp.eq.s32.totalorder %s902_s21, 0 }
  0x40   : > { %p1203_p3 = scmp.eq.s32.totalorder %s967_s22, 1  ;;  %p696_p7 = scmp.lt.s32.totalorder %s902_s21, 2 }
  0x41   : > { %s1072_s27 = scalar_select %p27_p6, %s898_s20, %s29_s29  }
  0x42   : > { %p1066_p5 = por %p1203_p3, %p36_p13  ;;  %p38_p9 = por %p37_p10, %p36_p13 }
  0x43   : > { %s208_s30 = sand.u32 1, %s898_s20   ;;  %s606_s6 = sshll.u32 %s902_s21, 7 }
  0x44   : > { %s1204_s23 = scalar_select %p1066_p5, 1, 0 }
  0x45   : > { %s605_s7 = sshll.u32 %s208_s30, 3  ;;  %s1079_s8 = scalar_lea.hbm %s1190_s0, %s606_s6 }
  0x46   : > { %s212_s9 = scalar_lea.vmem [#allocation2], %s605_s7  ;;  %p1083_p11 = pnand %p696_p7, %p38_p9 }
  0x47   : > { %s219_s10 = sshll.u32 %s212_s9, 4  ;;  %s209_s28 = scalar_lea.sflag [#allocation3], %s208_s30  ;;  %s1081_s10 = int_to_ptr.vmem [resolvable:$true] %s219_s10 }
  0x48   : > { %s802_s12 = scalar_lea.hbm %s1079_s8, 128  ;;  %p804_p0 = pneg %p1083_p11 }
  0x49   : > { %p803_p12 = scmp.ne.s32.totalorder %s1079_s8, %s802_s12  ;;  %s807_s17 = scalar_lea.hbm %s1190_s0, 256 }
  0x4a   : > { %p808_p13 = scmp.lt.u32.totalorder %s1079_s8, %s1190_s0  ;;  %p809_p6 = scmp.lt.u32.totalorder %s807_s17, %s802_s12 }
  0x4b   : > { %p805_p2 = pnand %p804_p0, %p803_p12  ;;  %p811_p3 = scmp.lt.u32.totalorder %s802_s12, %s1079_s8 }
  0x4c   : > { %p810_p10 = por %p809_p6, %p808_p13 }
  0x4d   : > { %p806_p1 = pneg %p805_p2 }
  0x4e   : > { %p812_p7 = por %p811_p3, %p810_p10 }
  0x50   : > { %p813_p9 = pnand %p812_p7, %p806_p1 }
  0x52   : > { %816 = shalt.err (!%p813_p9)
}
  0x53   : > { %s817_s30 = scalar_lea.vmem %s1081_s10, 128  ;;  %s908_s15 = smov [#allocation2]  }
  0x54   : > { %p818_p12 = scmp.ne.s32.totalorder %s1081_s10, %s817_s30  ;;  %s822_s16 = sshll.u32 %s908_s15, 4  ;;  %s823_s16 = int_to_ptr.vmem [resolvable:$false] %s822_s16 }
  0x55   : > { %s824_s9 = scalar_lea.vmem %s823_s16, 256  ;;  %p825_p4 = scmp.lt.s32.totalorder %s1081_s10, %s823_s16 }
  0x56   : > { %p820_p2 = pnand %p818_p12, %p804_p0  ;;  %p826_p13 = scmp.lt.s32.totalorder %s824_s9, %s817_s30 }
  0x58   : > { %p821_p5 = pneg %p820_p2  ;;  %p827_p6 = por %p826_p13, %p825_p4 }
  0x5a   : > { %p828_p10 = pnand %p827_p6, %p821_p5 }
  0x5c   : > { %831 = shalt.err (!%p828_p10)
}
  0x5d   : > { %689 = dma.hbm_to_vmem [thread:$0]  (!%p1083_p11), %s1079_s8, 128, %s1081_s10, %s209_s28  }
  0x5e   : > { %228 = sbr.rel (%p986_p8) target bundleno = 987 (0x3db), region = 40  ;;  %s1115_s12 = sand.u32 (!%p986_p8), 1, %s894_s19  }
  0x5f   : > { %s608_s13 = sshll.u32 (!%p986_p8), %s1115_s12, 3  ;;  %s231_s29 = scalar_lea.sflag (!%p986_p8), [#allocation3], %s1115_s12 }
  0x60   : > { %s234_s17 = scalar_lea.vmem (!%p986_p8), [#allocation2], %s608_s13  ;;  %p1206_p4 = scmp.ne.s32.totalorder (!%p986_p8), %s1199_s24, 0 }
  0x65   : > { %877 = dma.done.wait (%p1206_p4), %s231_s29, 128  }
  0x66   : > { %879 = vsyncadd (%p1206_p4), %s231_s29, 4294967168  ;;  %p1207_p5 = scmp.eq.s32.totalorder %s967_s22, 0 }
  0x68   : > { %881 = dma.done.wait (%p1207_p5), [#allocation6], 1024   ;;  %p1208_p8 = pmov %p1207_p5 }
  0x69   : > { %v909_v0 = vmov 0.0|0.0   ;;  %vm910_vm0 = vmmov 0   ;;  %v911_v1 = vmov 0.0   ;;  %v270_v2 = vld [vmem:[#allocation5] sm:$0xff]  ;;  %v271_v3 = vld [vmem:[#allocation5 + $0x8] sm:$0xff]  ;;  %v272_v4 = vld [vmem:[#allocation5 + $0x10] sm:$0xff]  ;;  %v481_v51 = vlaneseq }
  0x6a   : > { %883 = vsyncadd (%p1208_p8), [#allocation6], 4294966272  ;;  %655 = vmatprep.subr.bf16.mxu0 %v909_v0  ;;  %641 = vmatprep.mubr.msk.f32.mxu0 %vm910_vm0, %v911_v1  ;;  %v656_v5 = vpack.c.bf16 %v271_v3, %v270_v2  ;;  %v273_v6 = vld [vmem:[#allocation5 + $0x18] sm:$0xff]  ;;  %vm281_vm1 = vcmask 261120   ;;  %v361_v9 = vld [vmem:[#allocation7] sm:$0xff]  ;;  %s912_s11 = smov 32  }
  0x6b   : > { %661 = vmatprep.subr.bf16.mxu1 %v909_v0  ;;  %652 = vmatprep.mubr.msk.f32.mxu1 %vm910_vm0, %v911_v1  ;;  %v659_v7 = vpack.c.bf16 %v273_v6, %v272_v4  ;;  %v269_v8 = vld [vmem:[%s234_s17] sm:$0xff]  ;;  %v362_v10 = vld [vmem:[#allocation7 + $0x8] sm:$0xff]  ;;  %s913_s28 = smov 64   ;;  %v914_v49 = vmov 1966171168   ;;  %v482_v53 = vshrl.u32 %v481_v51, 7 }
  0x6c   : > { %657 = vmatpush3.bf16.msra.mxu0 %v656_v5  ;;  %v363_v11 = vld [vmem:[#allocation7 + $0x10] sm:$0xff]  ;;  %v662_v12 = vpack.c.bf16 %v362_v10, %v361_v9  ;;  %v364_v13 = vld [vmem:[#allocation7 + $0x18] sm:$0xff]  ;;  %v479_v50 = vunpack.c.l.s4 %v914_v49  ;;  %vm474_vm3 = vcmask 523264   ;;  %s622_s7 = sshll.u32 %s967_s22, 7  ;;  %s268_s6 = scalar_lea.vmem [#allocation8], %s608_s13 }
  0x6d   : > { %658 = vmatprep.subr.bf16.mxu0 %v909_v0  ;;  %v665_v14 = vpack.c.bf16 %v364_v13, %v363_v11  ;;  %v612_v15 = vld [vmem:[%s1192_s2] ss:$0 sm:$0xff]  ;;  %s511_s30 = sshll.u32 %s268_s6, 4  ;;  %s1146_s9 = scalar_lea.hbm %s1195_s5, %s622_s7  ;;  %s1148_s30 = int_to_ptr.vmem [resolvable:$true] %s511_s30 }
  0x6e   : > { %663 = vmatpush3.bf16.msra.mxu1 %v662_v12  ;;  %v615_v24 = vld [vmem:[%s1194_s4] ss:$0 sm:$0xff]  ;;  %v480_v52 = vunpack.c.0.s8 %v479_v50  ;;  %s497_s29 = scalar_lea.sflag [#allocation4], %s1115_s12  ;;  %s832_s17 = scalar_lea.vmem %s1148_s30, 128 }
  0x6f   : > { %664 = vmatprep.subr.bf16.mxu1 %v909_v0  ;;  %p833_p11 = scmp.ne.s32.totalorder %s1148_s30, %s832_s17  ;;  %p1209_p0 = scmp.ne.s32.totalorder %s1204_s23, 0 }
  0x70   : > { %660 = vmatpush3.bf16.msra.mxu0 %v659_v7  ;;  %v483_v54 = vsub.s32 %v480_v52, %v482_v53  ;;  %s915_s22 = smov [#allocation8]  }
  0x71   : > { %p834_p1 = pnand %p833_p11, %p1209_p0  ;;  %s836_s13 = sshll.u32 %s915_s22, 4  ;;  %s837_s13 = int_to_ptr.vmem [resolvable:$false] %s836_s13 }
  0x72   : > { %666 = vmatpush3.bf16.msra.mxu1 %v665_v14  ;;  %s838_s24 = scalar_lea.vmem %s837_s13, 256  ;;  %p839_p7 = scmp.lt.s32.totalorder %s1148_s30, %s837_s13 }
  0x73   : > { %642 = vmatmul.mubr.msk.f32.vlgmr.msra.gmra.mrb[0].mxu0 %vm281_vm1, %v269_v8  ;;  %p835_p3 = pneg %p834_p1  ;;  %p840_p9 = scmp.lt.s32.totalorder %s838_s24, %s832_s17 }
  0x75   : > { %p841_p12 = por %p840_p9, %p839_p7 }
  0x77   : > { %p842_p2 = pnand %p841_p12, %p835_p3 }
 0x146   : > { %v351_v16 = vpop.f32.mrb[0].mxu0 }
 0x147   : > { %v352_v17 = vadd.f32 %v612_v15, %v351_v16  ;;  %v643_v18 = vpop.f32.mrb[1].mxu0 }
 0x149   : > { %v356_v19 = vmin.f32 %v352_v17, 0.0  ;;  %vm355_vm2 = vcmp.gt.f32.partialorder %v352_v17, 0.0 }
 0x14b   : > { %v357_v20 = vmul.f32 1.442695, %v356_v19 }
 0x14d   : > { %742 = vpow2.f32 %v357_v20 }
 0x157   : > { %v743_v21 = vpop.eup %742 }
 0x158   : > { %v614_v22 = vadd.f32 -1.0, %v743_v21 }
 0x15a   : > { %v360_v23 = vsel %vm355_vm2, %v352_v17, %v614_v22 }
 0x15b   : > { %653 = vmatmul.mubr.msk.f32.vlgmr.msra.gmra.mrb[0].mxu1 %vm281_vm1, %v360_v23 }
 0x22e   : > { %v441_v25 = vpop.f32.mrb[0].mxu1 }
 0x22f   : > { %v442_v26 = vadd.f32 %v615_v24, %v441_v25  ;;  %v654_v27 = vpop.f32.mrb[1].mxu1 }
 0x231   : > { %v445_v28 = vmul.f32 %v442_v26, %v269_v8 }
 0x233   : > { %v446_v29 = vsel %vm281_vm1, %v445_v28, 0.0 }
 0x234   : > { %447 = vadd.xlane.f32.xlu0 %v446_v29 }
 0x2c1   : > { %v448_v30 = vpop.xlane.xlu0 %447 }
 0x2c2   : > { %v449_v31 = vrot.slane %v448_v30, 4  ;;  %v455_v32 = vmul.f32 %v448_v30, %v269_v8 }
 0x2c4   : > { %v450_v33 = vadd.f32 %v449_v31, %v448_v30  ;;  %v456_v34 = vsel %vm281_vm1, %v455_v32, 0.0 }
 0x2c5   : > { %v457_v35 = vrot.slane %v456_v34, 4 }
 0x2c6   : > { %v451_v36 = vrot.slane %v450_v33, 2 }
 0x2c7   : > { %v458_v37 = vadd.f32 %v457_v35, %v456_v34 }
 0x2c8   : > { %v452_v38 = vadd.f32 %v451_v36, %v450_v33 }
 0x2c9   : > { %v459_v40 = vrot.slane %v458_v37, 2 }
 0x2ca   : > { %v453_v39 = vrot.slane %v452_v38, 1 }
 0x2cb   : > { %v460_v42 = vadd.f32 %v459_v40, %v458_v37 }
 0x2cc   : > { %v454_v41 = vadd.f32 %v453_v39, %v452_v38 }
 0x2cd   : > { %v461_v43 = vrot.slane %v460_v42, 1 }
 0x2ce   : > { %744 = vrcp.f32 %v454_v41 }
 0x2cf   : > { %v462_v44 = vadd.f32 %v461_v43, %v460_v42 }
 0x2d8   : > { %v745_v45 = vpop.eup %744 }
 0x2d9   : > { %v464_v46 = vmul.f32 %v745_v45, %v462_v44 }
 0x2db   : > { %466 = vrot.lane.b32.xlu0 %v464_v46, %s912_s11 }
 0x34d   : > { %v467_v47 = vpop.permute.xlu0 %466 }
 0x34e   : > { %v469_v48 = vsel %vm281_vm1, %v464_v46, %v467_v47 }
 0x34f   : > { %471 = vrot.lane.b32.xlu1 %v469_v48, %s913_s28 }
 0x3c1   : > { %v472_v55 = vpop.permute.xlu1 %471 }
 0x3c2   : > { %v475_v56 = vsel %vm474_vm3, %v469_v48, %v472_v55 }
 0x3c3   : > { %v477_v57 = vcombine.low %v475_v56, %v475_v56 }
 0x3c5   : > { %v484_v58 = vrot.slane %v477_v57, %v483_v54 }
 0x3c7   : > { %v485_v59 = vcombine.low %v484_v58, %v484_v58 }
 0x3c9   : > { %v492_v60 = vrot.slane %v485_v59, %v483_v54 }
 0x3cb   : > { %v493_v61 = vcombine.low %v492_v60, %v492_v60 }
 0x3cd   : > { %495 = vst [vmem:[%s268_s6] sm:$0xff] %v493_v61 }
 0x3ce   : > { %845 = shalt.err (!%p842_p2)
}
 0x3cf   : > { %s846_s12 = scalar_lea.hbm %s1146_s9, 128  ;;  %s850_s10 = scalar_lea.hbm %s1195_s5, 256 }
 0x3d0   : > { %p847_p13 = scmp.ne.s32.totalorder %s1146_s9, %s846_s12  ;;  %p851_p4 = scmp.lt.u32.totalorder %s1146_s9, %s1195_s5 }
 0x3d1   : > { %p852_p5 = scmp.lt.u32.totalorder %s850_s10, %s846_s12  ;;  %p854_p11 = scmp.lt.u32.totalorder %s846_s12, %s1146_s9 }
 0x3d2   : > { %p848_p6 = pnand %p847_p13, %p1209_p0 }
 0x3d3   : > { %p853_p8 = por %p852_p5, %p851_p4 }
 0x3d4   : > { %p849_p10 = pneg %p848_p6 }
 0x3d5   : > { %p855_p1 = por %p854_p11, %p853_p8 }
 0x3d7   : > { %p856_p3 = pnand %p855_p1, %p849_p10 }
 0x3d9   : > { %859 = shalt.err (!%p856_p3)
}
 0x3da   : > { %677 = dma.vmem_to_hbm [thread:$0]  (%p1209_p0), %s1148_s30, 128, %s1146_s9, %s497_s29  }
 0x3db PF: > { %s523_s7 = sand.u32 1, %s890_s18   ;;  %p1210_p7 = scmp.ne.s32.totalorder %s1200_s25, 0 }
 0x3dc   : > { %p1211_p9 = scmp.ge.s32.totalorder %s902_s21, 2  ;;  %s524_s6 = scalar_lea.sflag [#allocation4], %s523_s7 }
 0x3de   : > { %p691_p12 = pnand %p1211_p9, %p1210_p7 }
 0x3e0   : > { %885 = dma.done.wait (!%p691_p12), %s524_s6, 128  }
 0x3e1   : > { %887 = vsyncadd (!%p691_p12), %s524_s6, 4294967168  ;;  %p19_p2 = scmp.ge.s32.totalorder %s1056_s14, 4   ;;  %s1212_s18 = smov %s894_s19 }
 0x3e2   : > { %s1213_s19 = smov %s898_s20  ;;  %s1214_s20 = smov %s1072_s27 }
 0x3e3   : > { %s1215_s21 = smov %s1056_s14  ;;  %21 = sbr.rel (!%p19_p2) target bundleno = 6 (0x6), region = 93 }
 0x3ea   :  { %529 = vsyncpa [#allocation3], 1 }
 0x3eb   :  { %531 = vsyncpa [#allocation3 + $0x1], 1 }
 0x3ec   :  { %532 = vsyncpa [#allocation6], 1 }
 0x3ed   :  { %533 = vsyncpa [#allocation4], 1 }
 0x3ee   :  { %535 = vsyncpa [#allocation4 + $0x1], 1 }

</bundles_post_ra>
